<compile_context>
chip_gen: v7x
topology: tpu7x:2x2x1
jax: 0.10.0
libtpu: 0.0.40
codegen_flags: <defaults>
</compile_context>

<pallas_src>
import functools

import jax
import jax.numpy as jnp
from jax.experimental import pallas as pl
from jax.experimental.pallas import tpu as pltpu

FEATURES = 32
H1 = 128
H2 = 32
OUT = 1


def _round_up(n, m):
    return ((n + m - 1) // m) * m


def mlp_kernel(x_ref, w1_ref, b1_ref, w2_ref, b2_ref, w3_ref, b3_ref, o_ref):
    """Fused 3-layer MLP + sigmoid on one row tile.

    x_ref : (TR, F)       activation tile (TR = tile_rows, multiple of 128)
    w1    : (F, 128)   b1: (1, 128)
    w2    : (128, 32)  b2: (1, 32)
    w3    : (1, 32)    b3: (1,)  in SMEM (scalar)
    o_ref : (1, TR//128, 128)   lane-dense output slab
    """
    x = x_ref[...]

    h1 = jnp.dot(x, w1_ref[...], preferred_element_type=jnp.float32) + b1_ref[...]
    h1 = jnp.maximum(h1, 0.0)
    # Dropout(0.2) in eval mode is identity.

    h2 = jnp.dot(h1, w2_ref[...], preferred_element_type=jnp.float32) + b2_ref[...]
    h2 = jnp.maximum(h2, 0.0)
    # Dropout(0.2) in eval mode is identity.

    # Third layer has N=1: do it on the VPU/XLU (multiply + lane reduce)
    # instead of a (TR, 32) x (32, 1) MXU matmul with a 1-lane output.
    p = h2 * w3_ref[...]                                   # (TR, 32)   VPU
    s = o_ref.shape[1]                                     # TR // 128
    z = jnp.sum(p.reshape(s, 128, p.shape[-1]), axis=-1)   # (s, 128)   XLU reduce
    z = z + b3_ref[0]                                      # SMEM scalar bias
    o_ref[...] = jax.nn.sigmoid(z)[None]                   # (1, s, 128) lane-dense


@functools.partial(jax.jit, static_argnames=("tile_rows",))
def neuralnet2_forward(x, params, tile_rows=1024):
    """Mirrors NeuralNet_2.forward (eval mode).

    x: (B, F) or (B, S, F) float32.
    Returns (B, 1, 1) or (B, S, 1) float32.
    """
    w1, b1, w2, b2, w3, b3 = params

    orig_ndim = x.ndim
    if orig_ndim == 2:
        x = x[:, None, :]            # PyTorch: x.unsqueeze(1)
    B, S, F = x.shape
    rows = B * S
    x2d = x.reshape(rows, F).astype(jnp.float32)

    # ---- choose the row tile (all shape math is static at trace time) ----
    rows128 = _round_up(rows, 128)
    tr_cap = max(_round_up(tile_rows, 128), 128)
    n_tiles = pl.cdiv(rows128, tr_cap)
    # v7x has two TensorCores; keep >= 2 grid steps when there is enough work.
    if n_tiles == 1 and rows128 >= 256:
        n_tiles = 2
    tr = _round_up(pl.cdiv(rows, n_tiles), 128)
    n_tiles = pl.cdiv(rows, tr)
    padded_rows = n_tiles * tr
    if padded_rows != rows:
        x2d = jnp.pad(x2d, ((0, padded_rows - rows), (0, 0)))
    tr_sub = tr // 128

    cost = pl.CostEstimate(
        flops=2 * padded_rows * (F * H1 + H1 * H2 + H2),
        transcendentals=padded_rows,
        bytes_accessed=4 * (padded_rows * (F + 1)
                            + F * H1 + H1 + H1 * H2 + H2 + H2 + 1),
    )

    out3d = pl.pallas_call(
        mlp_kernel,
        out_shape=jax.ShapeDtypeStruct((n_tiles, tr_sub, 128), jnp.float32),
        grid_spec=pltpu.PrefetchScalarGridSpec(
            num_scalar_prefetch=0,
            grid=(n_tiles,),
            in_specs=[
                pl.BlockSpec((tr, F), lambda i: (i, 0)),     # x tile
                pl.BlockSpec((F, H1), lambda i: (0, 0)),     # w1
                pl.BlockSpec((1, H1), lambda i: (0, 0)),     # b1
                pl.BlockSpec((H1, H2), lambda i: (0, 0)),    # w2
                pl.BlockSpec((1, H2), lambda i: (0, 0)),     # b2
                pl.BlockSpec((1, H2), lambda i: (0, 0)),     # w3 (out=1, in=32) row
                pl.BlockSpec(memory_space=pltpu.MemorySpace.SMEM),  # b3 scalar
            ],
            out_specs=pl.BlockSpec((1, tr_sub, 128), lambda i: (i, 0, 0)),
        ),
        compiler_params=pltpu.CompilerParams(
            dimension_semantics=("parallel",)),
        cost_estimate=cost,
    )(x2d, w1, b1, w2, b2, w3, b3)

    out = out3d.reshape(padded_rows)[:rows].reshape(B, S, OUT)
    return out


def init_params(key, features):
    """Deterministic init matching the PyTorch layer shapes.

    w1/w2 stored (in, out); w3 stored PyTorch-style (out=1, in=32) as a row
    vector; b3 stored as a (1,) scalar. U(-1/sqrt(fan_in), 1/sqrt(fan_in)).
    """
    ks = jax.random.split(key, 6)

    def unif(k, shape, fan_in):
        bound = 1.0 / (float(fan_in) ** 0.5)
        return jax.random.uniform(k, shape, jnp.float32, -bound, bound)

    w1 = unif(ks[0], (features, H1), features)
    b1 = unif(ks[1], (1, H1), features)
    w2 = unif(ks[2], (H1, H2), H1)
    b2 = unif(ks[3], (1, H2), H1)
    w3 = unif(ks[4], (1, H2), H2)       # (out_features, in_features) = (1, 32)
    b3 = unif(ks[5], (1,), H2)
    return (w1, b1, w2, b2, w3, b3)


def _reference(x, params):
    """Pure-JAX reference for a tolerance check."""
    w1, b1, w2, b2, w3, b3 = params
    if x.ndim == 2:
        x = x[:, None, :]
    h1 = jnp.maximum(x @ w1 + b1, 0.0)
    h2 = jnp.maximum(h1 @ w2 + b2, 0.0)
    return jax.nn.sigmoid(h2 @ w3.T + b3)


if __name__ == "__main__":
    key = jax.random.PRNGKey(0)
    k_x, k_p, k_x2 = jax.random.split(key, 3)
    params = init_params(k_p, FEATURES)

    # Small 2-D input (PyTorch unsqueeze path): (8, 32) -> (8, 1, 1)
    batch = 8
    x = jax.random.normal(k_x, (batch, FEATURES), dtype=jnp.float32)
    out = jax.block_until_ready(neuralnet2_forward(x, params))
    assert out.shape == (batch, 1, 1), out.shape
    ref = _reference(x, params)
    assert jnp.allclose(out, ref, atol=1e-5, rtol=1e-5), \
        float(jnp.max(jnp.abs(out - ref)))

    # 3-D input exercising the multi-tile grid + row padding path.
    x_big = jax.random.normal(k_x2, (4, 300, FEATURES), dtype=jnp.float32)
    out_big = jax.block_until_ready(neuralnet2_forward(x_big, params))
    assert out_big.shape == (4, 300, 1), out_big.shape
    ref_big = _reference(x_big, params)
    assert jnp.allclose(out_big, ref_big, atol=1e-5, rtol=1e-5), \
        float(jnp.max(jnp.abs(out_big - ref_big)))

    print("KERNEL_OK")
</pallas_src>

<mosaic_0001>
module attributes {stable_mosaic.version = 11 : i64} {
  func.func @mlp_kernel(%arg0: i32, %arg1: memref<128x32xf32, #tpu.memory_space<vmem>>, %arg2: memref<32x128xf32, #tpu.memory_space<vmem>>, %arg3: memref<1x128xf32, #tpu.memory_space<vmem>>, %arg4: memref<128x32xf32, #tpu.memory_space<vmem>>, %arg5: memref<1x32xf32, #tpu.memory_space<vmem>>, %arg6: memref<1x32xf32, #tpu.memory_space<vmem>>, %arg7: memref<1xf32, #tpu.memory_space<smem>>, %arg8: memref<1x1x128xf32, #tpu.memory_space<vmem>>) attributes {dimension_semantics = [#tpu.dimension_semantics<parallel>], iteration_bounds = array<i64: 1>, scalar_prefetch = 0 : i64, scratch_operands = 0 : i64, tpu.core_type = #tpu.core_type<tc>, window_params = [{transform_indices = @transform_0, window_bounds = array<i64: 128, 32>}, {pipeline_mode = #tpu.pipeline_mode<synchronous>, transform_indices = @transform_1, window_bounds = array<i64: 32, 128>}, {pipeline_mode = #tpu.pipeline_mode<synchronous>, transform_indices = @transform_2, window_bounds = array<i64: 1, 128>}, {pipeline_mode = #tpu.pipeline_mode<synchronous>, transform_indices = @transform_3, window_bounds = array<i64: 128, 32>}, {pipeline_mode = #tpu.pipeline_mode<synchronous>, transform_indices = @transform_4, window_bounds = array<i64: 1, 32>}, {pipeline_mode = #tpu.pipeline_mode<synchronous>, transform_indices = @transform_5, window_bounds = array<i64: 1, 32>}, {transform_indices = @transform_6, window_bounds = array<i64: 1>}, {transform_indices = @transform_7, window_bounds = array<i64: 1, 1, 128>}]} {
    %c0 = arith.constant 0 : index
    %c0_0 = arith.constant 0 : index
    %0 = vector.load %arg1[%c0, %c0_0] : memref<128x32xf32, #tpu.memory_space<vmem>>, vector<128x32xf32>
    %c0_1 = arith.constant 0 : index
    %c0_2 = arith.constant 0 : index
    %1 = vector.load %arg2[%c0_1, %c0_2] : memref<32x128xf32, #tpu.memory_space<vmem>>, vector<32x128xf32>
    %cst = arith.constant dense<0.000000e+00> : vector<128x128xf32>
    %2 = tpu.matmul %0, %1, %cst {dimension_numbers = #tpu.dot_dimension_numbers<[1], [0], [0], [1], [0, 0, 1, 1], [], []>} : vector<128x32xf32>, vector<32x128xf32>, vector<128x128xf32> -> vector<128x128xf32>
    %c0_3 = arith.constant 0 : index
    %c0_4 = arith.constant 0 : index
    %3 = vector.load %arg3[%c0_3, %c0_4] : memref<1x128xf32, #tpu.memory_space<vmem>>, vector<1x128xf32>
    %4 = vector.broadcast %3 : vector<1x128xf32> to vector<128x128xf32>
    %5 = arith.addf %2, %4 : vector<128x128xf32>
    %cst_5 = arith.constant 0.000000e+00 : f32
    %6 = vector.broadcast %cst_5 : f32 to vector<128x128xf32>
    %7 = arith.maximumf %5, %6 : vector<128x128xf32>
    %c0_6 = arith.constant 0 : index
    %c0_7 = arith.constant 0 : index
    %8 = vector.load %arg4[%c0_6, %c0_7] : memref<128x32xf32, #tpu.memory_space<vmem>>, vector<128x32xf32>
    %cst_8 = arith.constant dense<0.000000e+00> : vector<128x32xf32>
    %9 = tpu.matmul %7, %8, %cst_8 {dimension_numbers = #tpu.dot_dimension_numbers<[1], [0], [0], [1], [0, 0, 1, 1], [], []>} : vector<128x128xf32>, vector<128x32xf32>, vector<128x32xf32> -> vector<128x32xf32>
    %c0_9 = arith.constant 0 : index
    %c0_10 = arith.constant 0 : index
    %10 = vector.load %arg5[%c0_9, %c0_10] : memref<1x32xf32, #tpu.memory_space<vmem>>, vector<1x32xf32>
    %11 = vector.broadcast %10 : vector<1x32xf32> to vector<128x32xf32>
    %12 = arith.addf %9, %11 : vector<128x32xf32>
    %cst_11 = arith.constant 0.000000e+00 : f32
    %13 = vector.broadcast %cst_11 : f32 to vector<128x32xf32>
    %14 = arith.maximumf %12, %13 : vector<128x32xf32>
    %c0_12 = arith.constant 0 : index
    %c0_13 = arith.constant 0 : index
    %15 = vector.load %arg6[%c0_12, %c0_13] : memref<1x32xf32, #tpu.memory_space<vmem>>, vector<1x32xf32>
    %16 = vector.broadcast %15 : vector<1x32xf32> to vector<128x32xf32>
    %17 = arith.mulf %14, %16 : vector<128x32xf32>
    %18 = vector.shape_cast %17 : vector<128x32xf32> to vector<1x128x32xf32>
    %cst_14 = arith.constant dense<0.000000e+00> : vector<1x128xf32>
    %19 = vector.multi_reduction <add>, %18, %cst_14 [2] : vector<1x128x32xf32> to vector<1x128xf32>
    %c0_15 = arith.constant 0 : index
    %20 = memref.load %arg7[%c0_15] : memref<1xf32, #tpu.memory_space<smem>>
    %21 = vector.broadcast %20 : f32 to vector<1x128xf32>
    %22 = arith.addf %19, %21 : vector<1x128xf32>
    %23 = arith.negf %22 : vector<1x128xf32>
    %24 = math.exp %23 : vector<1x128xf32>
    %cst_16 = arith.constant 1.000000e+00 : f32
    %25 = vector.broadcast %cst_16 : f32 to vector<1x128xf32>
    %26 = arith.addf %25, %24 : vector<1x128xf32>
    %27 = arith.divf %25, %26 : vector<1x128xf32>
    %28 = vector.shape_cast %27 : vector<1x128xf32> to vector<1x1x128xf32>
    %c0_17 = arith.constant 0 : index
    %c0_18 = arith.constant 0 : index
    %c0_19 = arith.constant 0 : index
    %29 = vector.load %arg8[%c0_17, %c0_18, %c0_19] : memref<1x1x128xf32, #tpu.memory_space<vmem>>, vector<1x1x128xf32>
    tpu.vector_store %arg8[%c0_17, %c0_18, %c0_19], %28 {strides = array<i32>} : memref<1x1x128xf32, #tpu.memory_space<vmem>>, vector<1x1x128xf32>,
    return
  }
  func.func @transform_0(%arg0: i32) -> (i32, i32) {
    %c0_i32 = arith.constant 0 : i32
    %c0_i32_0 = arith.constant 0 : i32
    return %arg0, %c0_i32 : i32, i32
  }
  func.func @transform_1(%arg0: i32) -> (i32, i32) {
    %c0_i32 = arith.constant 0 : i32
    %c0_i32_0 = arith.constant 0 : i32
    %c0_i32_1 = arith.constant 0 : i32
    return %c0_i32, %c0_i32_0 : i32, i32
  }
  func.func @transform_2(%arg0: i32) -> (i32, i32) {
    %c0_i32 = arith.constant 0 : i32
    %c0_i32_0 = arith.constant 0 : i32
    %c0_i32_1 = arith.constant 0 : i32
    return %c0_i32, %c0_i32_0 : i32, i32
  }
  func.func @transform_3(%arg0: i32) -> (i32, i32) {
    %c0_i32 = arith.constant 0 : i32
    %c0_i32_0 = arith.constant 0 : i32
    %c0_i32_1 = arith.constant 0 : i32
    return %c0_i32, %c0_i32_0 : i32, i32
  }
  func.func @transform_4(%arg0: i32) -> (i32, i32) {
    %c0_i32 = arith.constant 0 : i32
    %c0_i32_0 = arith.constant 0 : i32
    %c0_i32_1 = arith.constant 0 : i32
    return %c0_i32, %c0_i32_0 : i32, i32
  }
  func.func @transform_5(%arg0: i32) -> (i32, i32) {
    %c0_i32 = arith.constant 0 : i32
    %c0_i32_0 = arith.constant 0 : i32
    %c0_i32_1 = arith.constant 0 : i32
    return %c0_i32, %c0_i32_0 : i32, i32
  }
  func.func @transform_6(%arg0: i32) -> i32 {
    %c0_i32 = arith.constant 0 : i32
    %c0_i32_0 = arith.constant 0 : i32
    return %c0_i32 : i32
  }
  func.func @transform_7(%arg0: i32) -> (i32, i32, i32) {
    %c0_i32 = arith.constant 0 : i32
    %c0_i32_0 = arith.constant 0 : i32
    %c0_i32_1 = arith.constant 0 : i32
    return %arg0, %c0_i32, %c0_i32_0 : i32, i32, i32
  }
}

</mosaic_0001>

<bundles_post_ra>
// kernel: neuralnet2_forward.1
= control target key start
LH: loop header
LB: loop body
LE: loop exit
PB: predicated region body
PF: predicated region fallthrough
CT: control target
= control target key end

     0   :  { %vm54_vm0 = vcmask 261120   ;;  %vm660_vm1 = vcmask 130112   ;;  %vm667_vm2 = vcmask 195712   ;;  %vm674_vm3 = vcmask 261312   ;;  %s1352_s1 = inlined_call_operand.vmem [shape: f32[32,128], index: 1, kind: input, shape index: {}]   ;;  %s1353_s0 = inlined_call_operand.vmem [shape: f32[128,32], index: 0, kind: input, shape index: {}]   ;;  %s1354_s3 = inlined_call_operand.vmem [shape: f32[128,32], index: 3, kind: input, shape index: {}]   ;;  %s1355_s2 = inlined_call_operand.vmem [shape: f32[1,128], index: 2, kind: input, shape index: {}]   ;;  %s1356_s4 = inlined_call_operand.vmem [shape: f32[1,32], index: 4, kind: input, shape index: {}]   ;;  %s1357_s5 = inlined_call_operand.vmem [shape: f32[1,32], index: 5, kind: input, shape index: {}]   ;;  %s1358_s6 = inlined_call_operand.<no memory space> [shape: f32[1], index: 6, kind: input, shape index: {}]   ;;  %s1359_s7 = inlined_call_operand.vmem [shape: f32[1,1,128], index: 7, kind: output, shape index: {}]  }
   0x1   :  { %v43_v0 = vld [vmem:[%s1352_s1] sm:$0xff]  ;;  %v44_v1 = vld [vmem:[%s1352_s1 + $0x8] sm:$0xff]  ;;  %v45_v2 = vld [vmem:[%s1352_s1 + $0x10] sm:$0xff]  ;;  %vm681_vm4 = vcmask 326912   ;;  %vm688_vm5 = vcmask 392512   ;;  %vm695_vm6 = vcmask 458112  }
   0x2   :  { %v941_v3 = vpack.c.bf16 %v44_v1, %v43_v0  ;;  %v46_v4 = vld [vmem:[%s1352_s1 + $0x18] sm:$0xff]  ;;  %v27_v5 = vld [vmem:[%s1353_s0] sm:$0xff]  ;;  %v265_v8 = vld [vmem:[%s1354_s3 + $0x8] sm:$0xff]  ;;  %vm702_vm7 = vcmask 523712   ;;  %vm709_vm8 = vcmask 589312   ;;  %vm716_vm9 = vcmask 654912  }
   0x3   :  { %v945_v6 = vpack.c.bf16 %v46_v4, %v45_v2  ;;  %861 = vmatprep.mubr.msk.f32.mxu0 %vm54_vm0, %v27_v5  ;;  %v264_v7 = vld [vmem:[%s1354_s3] sm:$0xff]  ;;  %v266_v9 = vld [vmem:[%s1354_s3 + $0x10] sm:$0xff]  ;;  %v267_v10 = vld [vmem:[%s1354_s3 + $0x18] sm:$0xff]  ;;  %vm723_vm10 = vcmask 720512   ;;  %vm730_vm11 = vcmask 786112   ;;  %vm737_vm12 = vcmask 851712  }
   0x4   :  { %942 = vmatprep.subr.bf16.mxu0 %v941_v3  ;;  %v28_v11 = vld [vmem:[%s1353_s0 + $0x8] sm:$0xff]  ;;  %v949_v12 = vpack.c.bf16 %v265_v8, %v264_v7  ;;  %v29_v13 = vld [vmem:[%s1353_s0 + $0x10] sm:$0xff]  ;;  %v953_v14 = vpack.c.bf16 %v267_v10, %v266_v9  ;;  %v268_v15 = vld [vmem:[%s1354_s3 + $0x20] sm:$0xff]  ;;  %vm744_vm13 = vcmask 917312   ;;  %vm751_vm14 = vcmask 982912  }
   0x5   :  { %944 = vmatpush3.bf16.msra.mxu0 %v941_v3  ;;  %v269_v16 = vld [vmem:[%s1354_s3 + $0x28] sm:$0xff]  ;;  %v30_v17 = vld [vmem:[%s1353_s0 + $0x18] sm:$0xff]  ;;  %v31_v18 = vld [vmem:[%s1353_s0 + $0x20] sm:$0xff]  ;;  %vm758_vm15 = vcmask 1048512  }
   0x6   :  { %946 = vmatprep.subr.bf16.mxu0 %v945_v6  ;;  %981 = vmatprep.subr.bf16.mxu1 %v949_v12  ;;  %v957_v19 = vpack.c.bf16 %v269_v16, %v268_v15  ;;  %v270_v20 = vld [vmem:[%s1354_s3 + $0x30] sm:$0xff]  ;;  %v271_v21 = vld [vmem:[%s1354_s3 + $0x38] sm:$0xff]  ;;  %v32_v22 = vld [vmem:[%s1353_s0 + $0x28] sm:$0xff] }
   0x7   :  { %989 = vmatpush3.bf16.msra.mxu1 %v949_v12  ;;  %v33_v23 = vld [vmem:[%s1353_s0 + $0x30] sm:$0xff]  ;;  %v961_v24 = vpack.c.bf16 %v271_v21, %v270_v20  ;;  %v272_v25 = vld [vmem:[%s1354_s3 + $0x40] sm:$0xff]  ;;  %v273_v26 = vld [vmem:[%s1354_s3 + $0x48] sm:$0xff] }
   0x8   :  { %982 = vmatprep.subr.bf16.mxu1 %v953_v14  ;;  %v34_v27 = vld [vmem:[%s1353_s0 + $0x38] sm:$0xff]  ;;  %v35_v28 = vld [vmem:[%s1353_s0 + $0x40] sm:$0xff]  ;;  %v965_v29 = vpack.c.bf16 %v273_v26, %v272_v25  ;;  %v274_v30 = vld [vmem:[%s1354_s3 + $0x50] sm:$0xff] }
   0x9   :  { %948 = vmatpush3.bf16.msra.mxu0 %v945_v6  ;;  %v275_v31 = vld [vmem:[%s1354_s3 + $0x58] sm:$0xff]  ;;  %v36_v32 = vld [vmem:[%s1353_s0 + $0x48] sm:$0xff]  ;;  %v37_v33 = vld [vmem:[%s1353_s0 + $0x50] sm:$0xff] }
   0xa   :  { %950 = vmatprep.subr.bf16.mxu0 %v949_v12  ;;  %v969_v34 = vpack.c.bf16 %v275_v31, %v274_v30  ;;  %v276_v35 = vld [vmem:[%s1354_s3 + $0x60] sm:$0xff]  ;;  %v277_v36 = vld [vmem:[%s1354_s3 + $0x68] sm:$0xff]  ;;  %v38_v37 = vld [vmem:[%s1353_s0 + $0x58] sm:$0xff] }
   0xb   :  { %990 = vmatpush3.bf16.msra.mxu1 %v953_v14  ;;  %v39_v38 = vld [vmem:[%s1353_s0 + $0x60] sm:$0xff]  ;;  %v973_v39 = vpack.c.bf16 %v277_v36, %v276_v35  ;;  %v40_v40 = vld [vmem:[%s1353_s0 + $0x68] sm:$0xff]  ;;  %v41_v41 = vld [vmem:[%s1353_s0 + $0x70] sm:$0xff] }
   0xc   :  { %862 = vmatmul.mubr.msk.f32.vlgmr.msra.gmra.mrb[0].mxu0 %vm54_vm0, %v28_v11  ;;  %983 = vmatprep.subr.bf16.mxu1 %v957_v19  ;;  %v42_v42 = vld [vmem:[%s1353_s0 + $0x78] sm:$0xff]  ;;  %v278_v43 = vld [vmem:[%s1354_s3 + $0x70] sm:$0xff]  ;;  %v766_v46 = vld [vmem:[%s1355_s2] ss:$0 sm:$0xff] }
   0xd   :  { %864 = vmatprep.mubr.msk.f32.mxu0 %vm54_vm0, %v29_v13  ;;  %952 = vmatpush3.bf16.msra.mxu0 %v949_v12  ;;  %v279_v44 = vld [vmem:[%s1354_s3 + $0x78] sm:$0xff]  ;;  %v1231_v31 = vld [vmem:[%s1356_s4] ss:$0 sm:$0xff] }
   0xe   :  { %954 = vmatprep.subr.bf16.mxu0 %v953_v14  ;;  %v977_v45 = vpack.c.bf16 %v279_v44, %v278_v43  ;;  %v1238_v36 = vld [vmem:[%s1357_s5] ss:$0 sm:$0xff] }
   0xf   :  { %991 = vmatpush3.bf16.msra.mxu1 %v957_v19 }
  0x10   :  { %865 = vmatmul.mubr.msk.f32.gmra.mrb[2].mxu0 %vm54_vm0, %v30_v17  ;;  %984 = vmatprep.subr.bf16.mxu1 %v961_v24 }
  0x11   :  { %867 = vmatprep.mubr.msk.f32.mxu0 %vm54_vm0, %v31_v18  ;;  %956 = vmatpush3.bf16.msra.mxu0 %v953_v14 }
  0x12   :  { %958 = vmatprep.subr.bf16.mxu0 %v957_v19 }
  0x13   :  { %992 = vmatpush3.bf16.msra.mxu1 %v961_v24 }
  0x14   :  { %868 = vmatmul.mubr.msk.f32.gmra.mrb[4].mxu0 %vm54_vm0, %v32_v22  ;;  %985 = vmatprep.subr.bf16.mxu1 %v965_v29 }
  0x15   :  { %870 = vmatprep.mubr.msk.f32.mxu0 %vm54_vm0, %v33_v23  ;;  %960 = vmatpush3.bf16.msra.mxu0 %v957_v19 }
  0x16   :  { %962 = vmatprep.subr.bf16.mxu0 %v961_v24 }
  0x17   :  { %993 = vmatpush3.bf16.msra.mxu1 %v965_v29 }
  0x18   :  { %871 = vmatmul.mubr.msk.f32.gmra.mrb[6].mxu0 %vm54_vm0, %v34_v27  ;;  %986 = vmatprep.subr.bf16.mxu1 %v969_v34 }
  0x19   :  { %873 = vmatprep.mubr.msk.f32.mxu0 %vm54_vm0, %v35_v28  ;;  %964 = vmatpush3.bf16.msra.mxu0 %v961_v24 }
  0x1a   :  { %966 = vmatprep.subr.bf16.mxu0 %v965_v29 }
  0x1b   :  { %994 = vmatpush3.bf16.msra.mxu1 %v969_v34 }
  0x1c   :  { %874 = vmatmul.mubr.msk.f32.gmra.mrb[8].mxu0 %vm54_vm0, %v36_v32  ;;  %987 = vmatprep.subr.bf16.mxu1 %v973_v39 }
  0x1d   :  { %876 = vmatprep.mubr.msk.f32.mxu0 %vm54_vm0, %v37_v33  ;;  %968 = vmatpush3.bf16.msra.mxu0 %v965_v29 }
  0x1e   :  { %970 = vmatprep.subr.bf16.mxu0 %v969_v34 }
  0x1f   :  { %995 = vmatpush3.bf16.msra.mxu1 %v973_v39 }
  0x20   :  { %877 = vmatmul.mubr.msk.f32.gmra.mrb[10].mxu0 %vm54_vm0, %v38_v37  ;;  %988 = vmatprep.subr.bf16.mxu1 %v977_v45 }
  0x21   :  { %879 = vmatprep.mubr.msk.f32.mxu0 %vm54_vm0, %v39_v38  ;;  %972 = vmatpush3.bf16.msra.mxu0 %v969_v34 }
  0x22   :  { %974 = vmatprep.subr.bf16.mxu0 %v973_v39 }
  0x23   :  { %996 = vmatpush3.bf16.msra.mxu1 %v977_v45 }
  0x24   :  { %880 = vmatmul.mubr.msk.f32.gmra.mrb[12].mxu0 %vm54_vm0, %v40_v40 }
  0x25   :  { %882 = vmatprep.mubr.msk.f32.mxu0 %vm54_vm0, %v41_v41  ;;  %976 = vmatpush3.bf16.msra.mxu0 %v973_v39 }
  0x26   :  { %978 = vmatprep.subr.bf16.mxu0 %v977_v45 }
  0x28   :  { %883 = vmatmul.mubr.msk.f32.gmra.mrb[14].mxu0 %vm54_vm0, %v42_v42 }
  0x29   :  { %980 = vmatpush3.bf16.msra.mxu0 %v977_v45 }
  0xdf   :  { %v863_v47 = vpop.f32.mrb[0].mxu0 }
  0xe0   :  { %v175_v48 = vadd.f32 %v863_v47, %v766_v46  ;;  %v169_v49 = vpop.f32.mrb[1].mxu0 }
  0xe1   :  { %v170_v50 = vadd.f32 %v766_v46, %v169_v49 }
  0xe2   :  { %v249_v53 = vmax.f32 %v175_v48, 0.0 }
  0xe3   :  { %v248_v51 = vmax.f32 %v170_v50, 0.0  ;;  %v866_v52 = vpop.f32.mrb[2].mxu0 }
  0xe4   :  { %v185_v54 = vadd.f32 %v866_v52, %v766_v46  ;;  %v179_v55 = vpop.f32.mrb[3].mxu0 }
  0xe5   :  { %v180_v56 = vadd.f32 %v766_v46, %v179_v55  ;;  %917 = vmatprep.mubr.f32.mxu0 %v248_v51 }
  0xe6   :  { %918 = vmatmul.mubr.f32.vlgmr.msra.gmra.mrb[16].mxu0 %v249_v53  ;;  %v251_v59 = vmax.f32 %v185_v54, 0.0 }
  0xe7   :  { %v250_v57 = vmax.f32 %v180_v56, 0.0  ;;  %v869_v58 = vpop.f32.mrb[4].mxu0 }
  0xe8   :  { %v195_v60 = vadd.f32 %v869_v58, %v766_v46  ;;  %v189_v61 = vpop.f32.mrb[5].mxu0 }
  0xe9   :  { %v190_v62 = vadd.f32 %v766_v46, %v189_v61  ;;  %920 = vmatprep.mubr.f32.mxu0 %v250_v57 }
  0xea   :  { %v253_v63 = vmax.f32 %v195_v60, 0.0  ;;  %921 = vmatmul.mubr.f32.gmra.mrb[18].mxu0 %v251_v59 }
  0xeb   :  { %v252_v0 = vmax.f32 %v190_v62, 0.0  ;;  %v872_v1 = vpop.f32.mrb[6].mxu0 }
  0xec   :  { %v205_v2 = vadd.f32 %v872_v1, %v766_v46  ;;  %v199_v3 = vpop.f32.mrb[7].mxu0 }
  0xed   :  { %923 = vmatprep.mubr.f32.mxu0 %v252_v0  ;;  %v200_v4 = vadd.f32 %v766_v46, %v199_v3 }
  0xee   :  { %v255_v5 = vmax.f32 %v205_v2, 0.0  ;;  %924 = vmatmul.mubr.f32.gmra.mrb[20].mxu0 %v253_v63 }
  0xef   :  { %v875_v6 = vpop.f32.mrb[8].mxu0  ;;  %v254_v7 = vmax.f32 %v200_v4, 0.0 }
  0xf0   :  { %v215_v8 = vadd.f32 %v875_v6, %v766_v46  ;;  %v209_v9 = vpop.f32.mrb[9].mxu0 }
  0xf1   :  { %v210_v10 = vadd.f32 %v766_v46, %v209_v9  ;;  %926 = vmatprep.mubr.f32.mxu1 %v254_v7 }
  0xf2   :  { %v257_v11 = vmax.f32 %v215_v8, 0.0  ;;  %927 = vmatmul.mubr.f32.vlgmr.msra.gmra.mrb[0].mxu1 %v255_v5 }
  0xf3   :  { %v256_v12 = vmax.f32 %v210_v10, 0.0  ;;  %v878_v13 = vpop.f32.mrb[10].mxu0 }
  0xf4   :  { %v225_v14 = vadd.f32 %v878_v13, %v766_v46  ;;  %v219_v15 = vpop.f32.mrb[11].mxu0 }
  0xf5   :  { %v220_v16 = vadd.f32 %v766_v46, %v219_v15  ;;  %929 = vmatprep.mubr.f32.mxu1 %v256_v12 }
  0xf6   :  { %v259_v17 = vmax.f32 %v225_v14, 0.0  ;;  %930 = vmatmul.mubr.f32.gmra.mrb[2].mxu1 %v257_v11 }
  0xf7   :  { %v258_v18 = vmax.f32 %v220_v16, 0.0  ;;  %v881_v19 = vpop.f32.mrb[12].mxu0 }
  0xf8   :  { %v235_v20 = vadd.f32 %v881_v19, %v766_v46  ;;  %v229_v21 = vpop.f32.mrb[13].mxu0 }
  0xf9   :  { %v230_v22 = vadd.f32 %v766_v46, %v229_v21  ;;  %932 = vmatprep.mubr.f32.mxu1 %v258_v18 }
  0xfa   :  { %v261_v23 = vmax.f32 %v235_v20, 0.0  ;;  %933 = vmatmul.mubr.f32.gmra.mrb[4].mxu1 %v259_v17 }
  0xfb   :  { %v260_v24 = vmax.f32 %v230_v22, 0.0  ;;  %v884_v25 = vpop.f32.mrb[14].mxu0 }
  0xfc   :  { %v245_v26 = vadd.f32 %v884_v25, %v766_v46  ;;  %v239_v27 = vpop.f32.mrb[15].mxu0 }
  0xfd   :  { %v240_v28 = vadd.f32 %v766_v46, %v239_v27  ;;  %935 = vmatprep.mubr.f32.mxu1 %v260_v24 }
  0xfe   :  { %v263_v29 = vmax.f32 %v245_v26, 0.0  ;;  %936 = vmatmul.mubr.f32.gmra.mrb[6].mxu1 %v261_v23 }
  0xff   :  { %v262_v30 = vmax.f32 %v240_v28, 0.0 }
 0x101   :  { %938 = vmatprep.mubr.f32.mxu1 %v262_v30 }
 0x102   :  { %939 = vmatmul.mubr.f32.gmra.mrb[8].mxu1 %v263_v29 }
 0x1b9   :  { %v919_v32 = vpop.f32.mrb[16].mxu0 }
 0x1ba   :  { %v359_v33 = vadd.f32 %v919_v32, %v1231_v31  ;;  %v353_v34 = vpop.f32.mrb[17].mxu0 }
 0x1bb   :  { %v354_v35 = vadd.f32 %v1231_v31, %v353_v34 }
 0x1bc   :  { %v433_v37 = vmax.f32 %v359_v33, 0.0 }
 0x1bd   :  { %v432_v38 = vmax.f32 %v354_v35, 0.0  ;;  %v922_v39 = vpop.f32.mrb[18].mxu0 }
 0x1be   :  { %v369_v40 = vadd.f32 %v922_v39, %v1231_v31  ;;  %v363_v41 = vpop.f32.mrb[19].mxu0  ;;  %v456_v42 = vmul.f32 %v1238_v36, %v433_v37 }
 0x1bf   :  { %v364_v43 = vadd.f32 %v1231_v31, %v363_v41  ;;  %v455_v46 = vmul.f32 %v1238_v36, %v432_v38 }
 0x1c0   :  { %v435_v44 = vmax.f32 %v369_v40, 0.0  ;;  %v474_v45 = vsel %vm54_vm0, %v456_v42, 0.0 }
 0x1c1   :  { %v434_v47 = vmax.f32 %v364_v43, 0.0  ;;  %475 = vadd.xlane.f32.xlu0 %v474_v45  ;;  %v925_v48 = vpop.f32.mrb[20].mxu0  ;;  %v471_v55 = vsel %vm54_vm0, %v455_v46, 0.0 }
 0x1c2   :  { %v379_v49 = vadd.f32 %v925_v48, %v1231_v31  ;;  %v373_v50 = vpop.f32.mrb[21].mxu0  ;;  %v458_v51 = vmul.f32 %v1238_v36, %v435_v44 }
 0x1c3   :  { %v374_v52 = vadd.f32 %v1231_v31, %v373_v50  ;;  %v457_v56 = vmul.f32 %v1238_v36, %v434_v47  ;;  %v1289_v50 = vstv %s1358_s6 }
 0x1c4   :  { %v437_v53 = vmax.f32 %v379_v49, 0.0  ;;  %v480_v54 = vsel %vm54_vm0, %v458_v51, 0.0 }
 0x1c5   :  { %v436_v57 = vmax.f32 %v374_v52, 0.0  ;;  %v928_v58 = vpop.f32.mrb[0].mxu1  ;;  %481 = vadd.xlane.f32.xlu1 %v480_v54  ;;  %472 = vadd.xlane.f32.xlu0 %v471_v55  ;;  %v477_v0 = vsel %vm54_vm0, %v457_v56, 0.0 }
 0x1c6   :  { %v389_v59 = vadd.f32 %v928_v58, %v1231_v31  ;;  %v383_v60 = vpop.f32.mrb[1].mxu1  ;;  %v460_v1 = vmul.f32 %v1238_v36, %v437_v53 }
 0x1c7   :  { %v384_v61 = vadd.f32 %v1231_v31, %v383_v60  ;;  %v459_v62 = vmul.f32 %v1238_v36, %v436_v57 }
 0x1c8   :  { %v439_v63 = vmax.f32 %v389_v59, 0.0  ;;  %v486_v10 = vsel %vm54_vm0, %v460_v1, 0.0 }
 0x1c9   :  { %v438_v2 = vmax.f32 %v384_v61, 0.0  ;;  %v931_v3 = vpop.f32.mrb[2].mxu1  ;;  %478 = vadd.xlane.f32.xlu1 %v477_v0  ;;  %v483_v4 = vsel %vm54_vm0, %v459_v62, 0.0 }
 0x1ca   :  { %v399_v5 = vadd.f32 %v931_v3, %v1231_v31  ;;  %v393_v6 = vpop.f32.mrb[3].mxu1  ;;  %484 = vadd.xlane.f32.xlu0 %v483_v4  ;;  %v462_v11 = vmul.f32 %v1238_v36, %v439_v63 }
 0x1cb   :  { %v394_v7 = vadd.f32 %v1231_v31, %v393_v6  ;;  %v461_v8 = vmul.f32 %v1238_v36, %v438_v2 }
 0x1cc   :  { %v441_v9 = vmax.f32 %v399_v5, 0.0  ;;  %v492_v20 = vsel %vm54_vm0, %v462_v11, 0.0 }
 0x1cd   :  { %v440_v12 = vmax.f32 %v394_v7, 0.0  ;;  %v934_v13 = vpop.f32.mrb[4].mxu1  ;;  %487 = vadd.xlane.f32.xlu1 %v486_v10  ;;  %v489_v14 = vsel %vm54_vm0, %v461_v8, 0.0 }
 0x1ce   :  { %v409_v15 = vadd.f32 %v934_v13, %v1231_v31  ;;  %v403_v16 = vpop.f32.mrb[5].mxu1  ;;  %490 = vadd.xlane.f32.xlu0 %v489_v14  ;;  %v464_v21 = vmul.f32 %v1238_v36, %v441_v9  ;;  %v649_v14 = vlaneseq }
 0x1cf   :  { %v404_v17 = vadd.f32 %v1231_v31, %v403_v16  ;;  %v463_v18 = vmul.f32 %v1238_v36, %v440_v12 }
 0x1d0   :  { %v443_v19 = vmax.f32 %v409_v15, 0.0  ;;  %v498_v30 = vsel %vm54_vm0, %v464_v21, 0.0 }
 0x1d1   :  { %v442_v22 = vmax.f32 %v404_v17, 0.0  ;;  %v937_v23 = vpop.f32.mrb[6].mxu1  ;;  %493 = vadd.xlane.f32.xlu1 %v492_v20  ;;  %v495_v24 = vsel %vm54_vm0, %v463_v18, 0.0 }
 0x1d2   :  { %v419_v25 = vadd.f32 %v937_v23, %v1231_v31  ;;  %v413_v26 = vpop.f32.mrb[7].mxu1  ;;  %496 = vadd.xlane.f32.xlu0 %v495_v24  ;;  %v466_v32 = vmul.f32 %v1238_v36, %v443_v19 }
 0x1d3   :  { %v414_v27 = vadd.f32 %v1231_v31, %v413_v26  ;;  %v465_v28 = vmul.f32 %v1238_v36, %v442_v22 }
 0x1d4   :  { %v445_v29 = vmax.f32 %v419_v25, 0.0  ;;  %v504_v42 = vsel %vm54_vm0, %v466_v32, 0.0  ;;  %v1302_v25 = vand.u32 127, %v649_v14 }
 0x1d5   :  { %v444_v33 = vmax.f32 %v414_v27, 0.0  ;;  %v940_v34 = vpop.f32.mrb[8].mxu1  ;;  %499 = vadd.xlane.f32.xlu1 %v498_v30  ;;  %v501_v35 = vsel %vm54_vm0, %v465_v28, 0.0 }
 0x1d6   :  { %v429_v37 = vadd.f32 %v940_v34, %v1231_v31  ;;  %v423_v38 = vpop.f32.mrb[9].mxu1  ;;  %502 = vadd.xlane.f32.xlu0 %v501_v35  ;;  %v468_v43 = vmul.f32 %v1238_v36, %v445_v29  ;;  %v1305_v35 = vshrl.u32 %v649_v14, 7 }
 0x1d7   :  { %v424_v39 = vadd.f32 %v1231_v31, %v423_v38  ;;  %v467_v40 = vmul.f32 %v1238_v36, %v444_v33 }
 0x1d8   :  { %v447_v41 = vmax.f32 %v429_v37, 0.0  ;;  %v510_v47 = vsel %vm54_vm0, %v468_v43, 0.0 }
 0x1d9   :  { %v446_v44 = vmax.f32 %v424_v39, 0.0  ;;  %505 = vadd.xlane.f32.xlu1 %v504_v42  ;;  %v507_v45 = vsel %vm54_vm0, %v467_v40, 0.0  ;;  %v655_v39 = vadd.s32 4294967288, %v1302_v25  ;;  %v669_v40 = vadd.s32 4294967272, %v1302_v25 }
 0x1da   :  { %508 = vadd.xlane.f32.xlu0 %v507_v45  ;;  %v470_v48 = vmul.f32 %v1238_v36, %v447_v41 }
 0x1db   :  { %v469_v46 = vmul.f32 %v1238_v36, %v446_v44 }
 0x1dc   :  { %v516_v49 = vsel %vm54_vm0, %v470_v48, 0.0 }
 0x1dd   :  { %511 = vadd.xlane.f32.xlu1 %v510_v47  ;;  %v513_v31 = vsel %vm54_vm0, %v469_v46, 0.0  ;;  %v653_v46 = vsub.s32 %v1302_v25, %v1305_v35  ;;  %v662_v47 = vadd.s32 4294967280, %v1302_v25 }
 0x1de   :  { %514 = vadd.xlane.f32.xlu0 %v513_v31 }
 0x1e1   :  { %517 = vadd.xlane.f32.xlu1 %v516_v49 }
 0x24e   :  { %v476_v51 = vpop.xlane.xlu0 %475 }
 0x24f   :  { %v522_v52 = vadd.f32 %v1289_v50, %v476_v51  ;;  %v676_v51 = vadd.s32 4294967264, %v1302_v25 }
 0x251   :  { %v786_v53 = vmul.f32 -1.442695, %v522_v52 }
 0x252   :  { %v482_v54 = vpop.xlane.xlu1 %481  ;;  %v473_v55 = vpop.xlane.xlu0 %472 }
 0x253   :  { %997 = vpow2.f32 %v786_v53  ;;  %v524_v36 = vadd.f32 %v1289_v50, %v482_v54  ;;  %v521_v56 = vadd.f32 %v1289_v50, %v473_v55  ;;  %v658_v55 = vsub.s32 %v655_v39, %v1305_v35 }
 0x255   :  { %v788_v57 = vmul.f32 -1.442695, %v524_v36  ;;  %v785_v58 = vmul.f32 -1.442695, %v521_v56  ;;  %v672_v36 = vsub.s32 %v669_v40, %v1305_v35 }
 0x256   :  { %v479_v59 = vpop.xlane.xlu1 %478 }
 0x257   :  { %999 = vpow2.f32 %v788_v57  ;;  %v523_v60 = vadd.f32 %v1289_v50, %v479_v59  ;;  %v485_v61 = vpop.xlane.xlu0 %484 }
 0x258   :  { %1001 = vpow2.f32 %v785_v58  ;;  %v525_v62 = vadd.f32 %v1289_v50, %v485_v61 }
 0x259   :  { %v787_v63 = vmul.f32 -1.442695, %v523_v60 }
 0x25a   :  { %v789_v0 = vmul.f32 -1.442695, %v525_v62  ;;  %v488_v1 = vpop.xlane.xlu1 %487  ;;  %v665_v62 = vsub.s32 %v662_v47, %v1305_v35  ;;  %v725_v47 = vadd.s32 4294967208, %v1302_v25 }
 0x25b   :  { %1003 = vpow2.f32 %v787_v63  ;;  %v526_v2 = vadd.f32 %v1289_v50, %v488_v1  ;;  %v491_v3 = vpop.xlane.xlu0 %490  ;;  %v683_v63 = vadd.s32 4294967256, %v1302_v25 }
 0x25c   :  { %1005 = vpow2.f32 %v789_v0  ;;  %v527_v4 = vadd.f32 %v1289_v50, %v491_v3  ;;  %v679_v3 = vsub.s32 %v676_v51, %v1305_v35 }
 0x25d   :  { %v998_v5 = vpop.eup %997  ;;  %v790_v6 = vmul.f32 -1.442695, %v526_v2 }
 0x25e   :  { %v586_v7 = vadd.f32 1.0, %v998_v5  ;;  %v791_v8 = vmul.f32 -1.442695, %v527_v4  ;;  %v494_v9 = vpop.xlane.xlu1 %493 }
 0x25f   :  { %1007 = vpow2.f32 %v790_v6  ;;  %v528_v10 = vadd.f32 %v1289_v50, %v494_v9  ;;  %v497_v11 = vpop.xlane.xlu0 %496  ;;  %v690_v9 = vadd.s32 4294967248, %v1302_v25 }
 0x260   :  { %v529_v12 = vadd.f32 %v1289_v50, %v497_v11  ;;  %1009 = vpow2.f32 %v791_v8 }
 0x261   :  { %v1000_v13 = vpop.eup %999  ;;  %v792_v15 = vmul.f32 -1.442695, %v528_v10  ;;  %1011 = vrcp.f32 %v586_v7 }
 0x262   :  { %v1002_v16 = vpop.eup %1001  ;;  %v588_v17 = vadd.f32 1.0, %v1000_v13  ;;  %v793_v18 = vmul.f32 -1.442695, %v529_v12  ;;  %v500_v19 = vpop.xlane.xlu1 %499  ;;  %v697_v13 = vadd.s32 4294967240, %v1302_v25 }
 0x263   :  { %v585_v20 = vadd.f32 1.0, %v1002_v16  ;;  %1013 = vpow2.f32 %v792_v15  ;;  %v530_v21 = vadd.f32 %v1289_v50, %v500_v19  ;;  %v503_v22 = vpop.xlane.xlu0 %502 }
 0x264   :  { %1015 = vrcp.f32 %v588_v17  ;;  %v531_v23 = vadd.f32 %v1289_v50, %v503_v22 }
 0x265   :  { %v1004_v24 = vpop.eup %1003  ;;  %1017 = vrcp.f32 %v585_v20  ;;  %v794_v26 = vmul.f32 -1.442695, %v530_v21  ;;  %v704_v20 = vadd.s32 4294967232, %v1302_v25 }
 0x266   :  { %v1006_v27 = vpop.eup %1005  ;;  %v587_v28 = vadd.f32 1.0, %v1004_v24  ;;  %1019 = vpow2.f32 %v793_v18  ;;  %v795_v29 = vmul.f32 -1.442695, %v531_v23  ;;  %v506_v30 = vpop.xlane.xlu1 %505  ;;  %v693_v24 = vsub.s32 %v690_v9, %v1305_v35 }
 0x267   :  { %v589_v32 = vadd.f32 1.0, %v1006_v27  ;;  %1021 = vpow2.f32 %v794_v26  ;;  %v532_v33 = vadd.f32 %v1289_v50, %v506_v30  ;;  %v509_v34 = vpop.xlane.xlu0 %508  ;;  %v711_v30 = vadd.s32 4294967224, %v1302_v25 }
 0x268   :  { %1023 = vrcp.f32 %v587_v28  ;;  %v533_v37 = vadd.f32 %v1289_v50, %v509_v34 }
 0x269   :  { %v1008_v38 = vpop.eup %1007  ;;  %1025 = vrcp.f32 %v589_v32  ;;  %v796_v41 = vmul.f32 -1.442695, %v532_v33 }
 0x26a   :  { %v590_v42 = vadd.f32 1.0, %v1008_v38  ;;  %1027 = vpow2.f32 %v795_v29  ;;  %v797_v43 = vmul.f32 -1.442695, %v533_v37  ;;  %v512_v44 = vpop.xlane.xlu1 %511  ;;  %v1010_v45 = vpop.eup %1009  ;;  %v700_v29 = vsub.s32 %v697_v13, %v1305_v35 }
 0x26b   :  { %1029 = vpow2.f32 %v796_v41  ;;  %v534_v48 = vadd.f32 %v1289_v50, %v512_v44  ;;  %v515_v31 = vpop.xlane.xlu0 %514  ;;  %v1012_v49 = vpop.eup %1011  ;;  %v591_v52 = vadd.f32 1.0, %v1010_v45  ;;  %v707_v38 = vsub.s32 %v704_v20, %v1305_v35 }
 0x26c   :  { %1031 = vrcp.f32 %v590_v42  ;;  %v535_v53 = vadd.f32 %v1289_v50, %v515_v31  ;;  %v659_v8 = vrot.slane %v1012_v49, %v658_v55  ;;  %v718_v41 = vadd.s32 4294967216, %v1302_v25 }
 0x26d   :  { %v1014_v54 = vpop.eup %1013  ;;  %1033 = vpow2.f32 %v797_v43  ;;  %v798_v56 = vmul.f32 -1.442695, %v534_v48  ;;  %v732_v49 = vadd.s32 4294967200, %v1302_v25 }
 0x26e   :  { %v1016_v57 = vpop.eup %1015  ;;  %1035 = vrcp.f32 %v591_v52  ;;  %v592_v58 = vadd.f32 1.0, %v1014_v54  ;;  %v799_v59 = vmul.f32 -1.442695, %v535_v53  ;;  %v518_v60 = vpop.xlane.xlu1 %517  ;;  %v721_v54 = vsub.s32 %v718_v41, %v1305_v35 }
 0x26f   :  { %v1018_v61 = vpop.eup %1017  ;;  %1037 = vpow2.f32 %v798_v56  ;;  %v536_v0 = vadd.f32 %v1289_v50, %v518_v60  ;;  %v686_v50 = vsub.s32 %v683_v63, %v1305_v35  ;;  %v673_v15 = vrot.slane %v1016_v57, %v672_v36 }
 0x270   :  { %v1020_v1 = vpop.eup %1019  ;;  %v654_v2 = vrot.slane %v1018_v61, %v653_v46  ;;  %1039 = vrcp.f32 %v592_v58  ;;  %v714_v46 = vsub.s32 %v711_v30, %v1305_v35  ;;  %v728_v57 = vsub.s32 %v725_v47, %v1305_v35 }
 0x271   :  { %v1022_v4 = vpop.eup %1021  ;;  %v593_v5 = vadd.f32 1.0, %v1020_v1  ;;  %1041 = vpow2.f32 %v799_v59  ;;  %v800_v6 = vmul.f32 -1.442695, %v536_v0  ;;  %v739_v58 = vadd.s32 4294967192, %v1302_v25 }
 0x272   :  { %v1024_v7 = vpop.eup %1023  ;;  %v594_v10 = vadd.f32 1.0, %v1022_v4  ;;  %v661_v16 = vsel %vm660_vm1, %v659_v8, %v654_v2  ;;  %v735_v61 = vsub.s32 %v732_v49, %v1305_v35  ;;  %v746_v1 = vadd.s32 4294967184, %v1302_v25 }
 0x273   :  { %v1026_v11 = vpop.eup %1025  ;;  %v666_v12 = vrot.slane %v1024_v7, %v665_v62  ;;  %1043 = vrcp.f32 %v593_v5  ;;  %v742_v4 = vsub.s32 %v739_v58, %v1305_v35 }
 0x274   :  { %v1028_v14 = vpop.eup %1027  ;;  %v680_v17 = vrot.slane %v1026_v11, %v679_v3  ;;  %1045 = vrcp.f32 %v594_v10  ;;  %v749_v10 = vsub.s32 %v746_v1, %v1305_v35 }
 0x275   :  { %v1030_v18 = vpop.eup %1029  ;;  %v668_v19 = vsel %vm667_vm2, %v666_v12, %v661_v16  ;;  %v595_v21 = vadd.f32 1.0, %v1028_v14  ;;  %1047 = vpow2.f32 %v800_v6  ;;  %v753_v6 = vadd.s32 4294967176, %v1302_v25 }
 0x276   :  { %v1032_v22 = vpop.eup %1031  ;;  %v675_v23 = vsel %vm674_vm3, %v673_v15, %v668_v19  ;;  %v596_v26 = vadd.f32 1.0, %v1030_v18 }
 0x277   :  { %v1034_v27 = vpop.eup %1033  ;;  %v687_v28 = vrot.slane %v1032_v22, %v686_v50  ;;  %1049 = vrcp.f32 %v595_v21  ;;  %v682_v33 = vsel %vm681_vm4, %v680_v17, %v675_v23  ;;  %v756_v13 = vsub.s32 %v753_v6, %v1305_v35 }
 0x278   :  { %v1036_v32 = vpop.eup %1035  ;;  %1051 = vrcp.f32 %v596_v26  ;;  %v597_v34 = vadd.f32 1.0, %v1034_v27 }
 0x279   :  { %v1038_v37 = vpop.eup %1037  ;;  %v694_v40 = vrot.slane %v1036_v32, %v693_v24  ;;  %v689_v44 = vsel %vm688_vm5, %v687_v28, %v682_v33 }
 0x27a   :  { %v1040_v39 = vpop.eup %1039  ;;  %1053 = vrcp.f32 %v597_v34  ;;  %v598_v42 = vadd.f32 1.0, %v1038_v37 }
 0x27b   :  { %v1042_v43 = vpop.eup %1041  ;;  %v701_v45 = vrot.slane %v1040_v39, %v700_v29  ;;  %v696_v52 = vsel %vm695_vm6, %v694_v40, %v689_v44 }
 0x27c   :  { %1055 = vrcp.f32 %v598_v42  ;;  %v599_v48 = vadd.f32 1.0, %v1042_v43 }
 0x27d   :  { %v1044_v31 = vpop.eup %1043  ;;  %v703_v36 = vsel %vm702_vm7, %v701_v45, %v696_v52 }
 0x27e   :  { %v1046_v51 = vpop.eup %1045  ;;  %v708_v53 = vrot.slane %v1044_v31, %v707_v38  ;;  %1057 = vrcp.f32 %v599_v48 }
 0x27f   :  { %v1048_v55 = vpop.eup %1047  ;;  %v715_v56 = vrot.slane %v1046_v51, %v714_v46 }
 0x280   :  { %v600_v59 = vadd.f32 1.0, %v1048_v55  ;;  %v710_v63 = vsel %vm709_vm8, %v708_v53, %v703_v36 }
 0x281   :  { %v1050_v60 = vpop.eup %1049  ;;  %v717_v2 = vsel %vm716_vm9, %v715_v56, %v710_v63 }
 0x282   :  { %v1052_v62 = vpop.eup %1051  ;;  %v722_v0 = vrot.slane %v1050_v60, %v721_v54  ;;  %1059 = vrcp.f32 %v600_v59 }
 0x283   :  { %v729_v3 = vrot.slane %v1052_v62, %v728_v57 }
 0x284   :  { %v1054_v5 = vpop.eup %1053  ;;  %v724_v8 = vsel %vm723_vm10, %v722_v0, %v717_v2 }
 0x285   :  { %v736_v9 = vrot.slane %v1054_v5, %v735_v61  ;;  %v731_v11 = vsel %vm730_vm11, %v729_v3, %v724_v8 }
 0x286   :  { %v1056_v7 = vpop.eup %1055 }
 0x287   :  { %v743_v12 = vrot.slane %v1056_v7, %v742_v4  ;;  %v738_v14 = vsel %vm737_vm12, %v736_v9, %v731_v11 }
 0x288   :  { %v1058_v50 = vpop.eup %1057 }
 0x289   :  { %v750_v15 = vrot.slane %v1058_v50, %v749_v10  ;;  %v745_v16 = vsel %vm744_vm13, %v743_v12, %v738_v14 }
 0x28b   :  { %v752_v25 = vsel %vm751_vm14, %v750_v15, %v745_v16 }
 0x28c   :  { %v1060_v17 = vpop.eup %1059 }
 0x28d   :  { %v757_v18 = vrot.slane %v1060_v17, %v756_v13 }
 0x28f   :  { %v759_v19 = vsel %vm758_vm15, %v757_v18, %v752_v25 }
 0x290   :  { %761 = vst [vmem:[%s1359_s7] sm:$0x1] %v759_v19 }

</bundles_post_ra>
